<compile_context>
chip_gen: v5e
topology: v5e:2x2
jax: 0.10.0
libtpu: 0.0.40
codegen_flags: <defaults>
</compile_context>

<pallas_src>
import jax
import jax.numpy as jnp
from jax.experimental import pallas as pl
from jax.experimental.pallas import tpu as pltpu


def _round_up(v: int, m: int) -> int:
    return ((v + m - 1) // m) * m


def _plnet_dist_kernel(x_ref, c_ref, csq_ref, out_ref):
    """One (tb x tc) tile of -||x_i - e_j||^2.

    x_ref   : (tb, D)  feature tile, native dtype (bf16 ok -> MXU fast path)
    c_ref   : (D, tc)  centers tile (embeds.T, class dim on lanes)
    csq_ref : (1, tc)  precomputed ||e_j||^2 (f32, hoisted out of the kernel)
    out_ref : (tb, tc) -dist tile
    """
    x = x_ref[...]                                   # keep native dtype for the MXU
    xf = x.astype(jnp.float32)
    # per-row ||x||^2; XLU reduction, ~1/tc of the matmul FLOPs -> free filler
    # while the MXU works (with typical n_classes there is a single C tile anyway).
    feat_sq = jnp.sum(xf * xf, axis=1, keepdims=True)            # (tb, 1) f32
    # MXU matmul with f32 accumulation.
    xc = jnp.dot(x, c_ref[...], preferred_element_type=jnp.float32)  # (tb, tc)
    # Fused epilogue: -dist = 2*x@c - ||x||^2 - ||c||^2 (no temporary, no negate pass).
    out_ref[...] = (2.0 * xc - feat_sq - csq_ref[...]).astype(out_ref.dtype)


def pairwise_neg_sqdist(x, embeds, *, tb=None, tc=None, out_dtype=jnp.float32):
    """-||x_i - e_j||^2 for all pairs.  x: (B, D), embeds: (C, D) -> (B, C)."""
    B, D = x.shape
    C, De = embeds.shape
    assert D == De, "feature dim mismatch"

    # Tile sizes: lane/MXU aligned, clamped to the (padded) problem size.
    if tb is None:
        tb = min(256, _round_up(B, 8))          # sublane-aligned batch tile
    if tc is None:
        tc = min(512, _round_up(C, 128))        # lane-dense class tile
    B_pad = _round_up(B, tb)
    C_pad = _round_up(C, tc)

    # Centers laid out (D, C_pad): class dim on lanes -> lane-dense matmul RHS
    # and lane-dense output stores. Zero padding; padded cols are sliced off.
    centers = jnp.pad(embeds.T, ((0, 0), (0, C_pad - C)))
    # ||e_j||^2 computed once here (O(1)) instead of per grid step inside the kernel.
    cent_sq = jnp.sum(centers.astype(jnp.float32) ** 2, axis=0, keepdims=True)  # (1, C_pad)
    x_p = jnp.pad(x, ((0, B_pad - B), (0, 0)))

    grid = (B_pad // tb, C_pad // tc)

    itemsize = lambda a: jnp.dtype(a.dtype).itemsize
    cost = pl.CostEstimate(
        flops=2 * B_pad * C_pad * D,
        transcendentals=0,
        bytes_accessed=(x_p.size * itemsize(x_p)
                        + centers.size * itemsize(centers)
                        + cent_sq.size * 4
                        + B_pad * C_pad * jnp.dtype(out_dtype).itemsize),
    )

    neg_dist = pl.pallas_call(
        _plnet_dist_kernel,
        out_shape=jax.ShapeDtypeStruct((B_pad, C_pad), out_dtype),
        grid_spec=pltpu.PrefetchScalarGridSpec(
            num_scalar_prefetch=0,
            grid=grid,
            in_specs=[
                pl.BlockSpec((tb, D), lambda i, j: (i, 0)),   # batch tile of x
                pl.BlockSpec((D, tc), lambda i, j: (0, j)),   # class tile of centers
                pl.BlockSpec((1, tc), lambda i, j: (0, j)),   # hoisted ||e||^2 tile
            ],
            out_specs=pl.BlockSpec((tb, tc), lambda i, j: (i, j)),
        ),
        compiler_params=pltpu.CompilerParams(
            dimension_semantics=("parallel", "parallel"),   # both axes shardable on v7x
            vmem_limit_bytes=64 * 1024 * 1024,
        ),
        cost_estimate=cost,
    )(x_p, centers, cent_sq)

    return neg_dist[:B, :C]


def batchnorm1d_infer(x, gamma, beta, running_mean, running_var, eps=1e-5):
    """nn.BatchNorm1d in eval mode (running statistics), plain JAX elementwise."""
    inv = gamma * jax.lax.rsqrt(running_var + eps)
    return x * inv + (beta - running_mean * inv)


def plnet_forward(features, embeds, bn_params, n_classes, *, tb=None, tc=None):
    """PLNet.forward after the backbone: pred = -L2dist(bn(x), embeds)[:, :n_classes]."""
    # TODO(synk): the resnet18 feature_extractor backbone is not translated to a
    # Pallas kernel; `features` is assumed to be its (B, feature_size) output.
    # TODO(synk): training-mode BatchNorm (batch statistics + momentum update) is
    # not implemented; inference-mode running-stats BN is applied here.
    x = batchnorm1d_infer(features, *bn_params)
    pred = pairwise_neg_sqdist(x, embeds, tb=tb, tc=tc)
    return pred[:, :n_classes]


if __name__ == "__main__":
    key = jax.random.PRNGKey(0)
    k_x, k_e, k_g, k_b = jax.random.split(key, 4)

    batch, feat_dim = 8, 32
    n_embeds, n_classes = 10, 10          # module: embeds = Parameter(randn(10, feature_size))

    features = jax.random.normal(k_x, (batch, feat_dim), dtype=jnp.float32)
    embeds = jax.random.normal(k_e, (n_embeds, feat_dim), dtype=jnp.float32)
    gamma = 1.0 + 0.1 * jax.random.normal(k_g, (feat_dim,), dtype=jnp.float32)
    beta = 0.1 * jax.random.normal(k_b, (feat_dim,), dtype=jnp.float32)
    running_mean = jnp.zeros((feat_dim,), jnp.float32)
    running_var = jnp.ones((feat_dim,), jnp.float32)
    bn_params = (gamma, beta, running_mean, running_var)

    pred = plnet_forward(features, embeds, bn_params, n_classes)
    jax.block_until_ready(pred)

    # pure-JAX reference
    xn = batchnorm1d_infer(features, *bn_params)
    dist = (jnp.sum(xn * xn, axis=1, keepdims=True)
            + jnp.sum(embeds * embeds, axis=1)[None, :]
            - 2.0 * (xn @ embeds.T))
    ref = (-dist)[:, :n_classes]

    assert pred.shape == (batch, n_classes)
    assert jnp.allclose(pred, ref, atol=1e-4, rtol=1e-4), "mismatch vs reference"

    print("KERNEL_OK")
</pallas_src>

<mosaic_0001>
module attributes {stable_mosaic.version = 11 : i64} {
  func.func @_plnet_dist_kernel(%arg0: i32, %arg1: i32, %arg2: memref<8x32xf32, #tpu.memory_space<vmem>>, %arg3: memref<32x128xf32, #tpu.memory_space<vmem>>, %arg4: memref<1x128xf32, #tpu.memory_space<vmem>>, %arg5: memref<8x128xf32, #tpu.memory_space<vmem>>) attributes {dimension_semantics = [#tpu.dimension_semantics<parallel>, #tpu.dimension_semantics<parallel>], iteration_bounds = array<i64: 1, 1>, scalar_prefetch = 0 : i64, scratch_operands = 0 : i64, tpu.core_type = #tpu.core_type<tc>, window_params = [{transform_indices = @transform_0, window_bounds = array<i64: 8, 32>}, {transform_indices = @transform_1, window_bounds = array<i64: 32, 128>}, {transform_indices = @transform_2, window_bounds = array<i64: 1, 128>}, {transform_indices = @transform_3, window_bounds = array<i64: 8, 128>}]} {
    %c0 = arith.constant 0 : index
    %c0_0 = arith.constant 0 : index
    %0 = vector.load %arg2[%c0, %c0_0] : memref<8x32xf32, #tpu.memory_space<vmem>>, vector<8x32xf32>
    %1 = arith.mulf %0, %0 : vector<8x32xf32>
    %cst = arith.constant dense<0.000000e+00> : vector<8xf32>
    %2 = vector.multi_reduction <add>, %1, %cst [1] : vector<8x32xf32> to vector<8xf32>
    %3 = vector.shape_cast %2 : vector<8xf32> to vector<8x1xf32>
    %c0_1 = arith.constant 0 : index
    %c0_2 = arith.constant 0 : index
    %4 = vector.load %arg3[%c0_1, %c0_2] : memref<32x128xf32, #tpu.memory_space<vmem>>, vector<32x128xf32>
    %cst_3 = arith.constant dense<0.000000e+00> : vector<8x128xf32>
    %5 = tpu.matmul %0, %4, %cst_3 {dimension_numbers = #tpu.dot_dimension_numbers<[1], [0], [0], [1], [0, 0, 1, 1], [], []>} : vector<8x32xf32>, vector<32x128xf32>, vector<8x128xf32> -> vector<8x128xf32>
    %cst_4 = arith.constant 2.000000e+00 : f32
    %6 = vector.broadcast %cst_4 : f32 to vector<8x128xf32>
    %7 = arith.mulf %6, %5 : vector<8x128xf32>
    %8 = vector.broadcast %3 : vector<8x1xf32> to vector<8x128xf32>
    %9 = arith.subf %7, %8 : vector<8x128xf32>
    %c0_5 = arith.constant 0 : index
    %c0_6 = arith.constant 0 : index
    %10 = vector.load %arg4[%c0_5, %c0_6] : memref<1x128xf32, #tpu.memory_space<vmem>>, vector<1x128xf32>
    %11 = vector.broadcast %10 : vector<1x128xf32> to vector<8x128xf32>
    %12 = arith.subf %9, %11 : vector<8x128xf32>
    %c0_7 = arith.constant 0 : index
    %c0_8 = arith.constant 0 : index
    %13 = vector.load %arg5[%c0_7, %c0_8] : memref<8x128xf32, #tpu.memory_space<vmem>>, vector<8x128xf32>
    tpu.vector_store %arg5[%c0_7, %c0_8], %12 {strides = array<i32>} : memref<8x128xf32, #tpu.memory_space<vmem>>, vector<8x128xf32>,
    return
  }
  func.func @transform_0(%arg0: i32, %arg1: i32) -> (i32, i32) {
    %c0_i32 = arith.constant 0 : i32
    %c0_i32_0 = arith.constant 0 : i32
    return %arg0, %c0_i32 : i32, i32
  }
  func.func @transform_1(%arg0: i32, %arg1: i32) -> (i32, i32) {
    %c0_i32 = arith.constant 0 : i32
    %c0_i32_0 = arith.constant 0 : i32
    return %c0_i32, %arg1 : i32, i32
  }
  func.func @transform_2(%arg0: i32, %arg1: i32) -> (i32, i32) {
    %c0_i32 = arith.constant 0 : i32
    %c0_i32_0 = arith.constant 0 : i32
    return %c0_i32, %arg1 : i32, i32
  }
  func.func @transform_3(%arg0: i32, %arg1: i32) -> (i32, i32) {
    %c0_i32 = arith.constant 0 : i32
    return %arg0, %arg1 : i32, i32
  }
}

</mosaic_0001>

<bundles_post_ra>
// kernel: tpu_custom_call.1
= control target key start
LH: loop header
LB: loop body
LE: loop exit
PB: predicated region body
PF: predicated region fallthrough
CT: control target
= control target key end

     0   :  { %8 = vsyncpa [#allocation3], 0  ;;  %s226_s0 = inlined_call_operand.hbm [shape: f32[8,32], index: 0, kind: input, shape index: {}]   ;;  %s227_s1 = inlined_call_operand.hbm [shape: f32[32,128], index: 1, kind: input, shape index: {}]   ;;  %s228_s2 = inlined_call_operand.vmem [shape: f32[1,128], index: 2, kind: input, shape index: {}]   ;;  %s229_s3 = inlined_call_operand.hbm [shape: f32[8,128], index: 3, kind: output, shape index: {}]  }
   0x1   :  { %9 = vsyncpa [#allocation6], 0 }
   0x2   :  { %10 = vsyncpa [#allocation4], 0  ;;  %s16_s14 = sshll.u32 %s226_s0, 4  ;;  %s189_s15 = smov [#allocation2]   ;;  %s17_s14 = int_to_ptr.hbm [resolvable:$true] %s16_s14 }
   0x3   :  { %s18_s16 = sshll.u32 %s189_s15, 4  ;;  %s26_s19 = sshll.u32 %s227_s1, 4  ;;  %s19_s16 = int_to_ptr.vmem [resolvable:$true] %s18_s16  ;;  %s27_s19 = int_to_ptr.hbm [resolvable:$true] %s26_s19 }
   0x4   :  { %21 = dma.hbm_to_vmem [thread:$0]  %s17_s14, 128, %s19_s16, [#allocation3]  }
   0x5   :  { %s190_s20 = smov [#allocation5]   ;;  %s191_s22 = smov 128  }
   0x6   :  { %s28_s21 = sshll.u32 %s190_s20, 4  ;;  %s192_s23 = smov 8   ;;  %s29_s21 = int_to_ptr.vmem [resolvable:$true] %s28_s21 }
   0x7   :  { %34 = dma.hbm_to_vmem [thread:$0]  %s27_s19, 512, %s29_s21, [#allocation6], %s191_s22, %s191_s22, %s192_s23  }
   0x8   :  { %183 = dma.done.wait [#allocation3], 128  }
   0x9   :  { %184 = vsyncadd [#allocation3], 4294967168 }
   0xa   :  { %185 = dma.done.wait [#allocation6], 512  }
   0xb   :  { %186 = vsyncadd [#allocation6], 4294966784  ;;  %v54_v0 = vld [vmem:[#allocation5 + $0x18] sm:$0xff]  ;;  %v53_v1 = vld [vmem:[#allocation5 + $0x10] sm:$0xff]  ;;  %vm47_vm0 = vcmask 261120   ;;  %s193_s24 = smov [#allocation7]  }
   0xc   :  { %70 = vmatpush.msra.mxu0 %v54_v0  ;;  %v45_v2 = vld [vmem:[#allocation2] sm:$0xff]  ;;  %v52_v3 = vld [vmem:[#allocation5 + $0x8] sm:$0xff]  ;;  %v51_v5 = vld [vmem:[#allocation5] sm:$0xff]  ;;  %s91_s25 = sshll.u32 %s193_s24, 4  ;;  %s93_s28 = sshll.u32 %s229_s3, 4  ;;  %s92_s25 = int_to_ptr.vmem [resolvable:$true] %s91_s25  ;;  %s94_s28 = int_to_ptr.hbm [resolvable:$true] %s93_s28 }
   0xd   :  { %v46_v4 = vmul.f32 %v45_v2, %v45_v2  ;;  %v110_v10 = vld [vmem:[%s228_s2] ss:$0 sm:$0xff] }
   0xe   :  { %71 = vmatpush.msra.mxu0 %v53_v1 }
   0xf   :  { %v48_v6 = vsel %vm47_vm0, %v46_v4, 0.0 }
  0x10   :  { %72 = vmatpush.msra.mxu0 %v52_v3  ;;  %49 = vadd.xlane.f32.xlu0 %v48_v6 }
  0x12   :  { %73 = vmatpush.msra.mxu0 %v51_v5 }
  0x13   :  { %104 = vmatmul.msk.f32.vlgmr.msra.gmra.mxu0 %vm47_vm0, %v45_v2 }
  0x83   :  { %v50_v8 = vpop.xlane.xlu0 %49 }
  0x90   :  { %v75_v7 = vpop.f32.mrf.mxu0 }
  0x91   :  { %v78_v9 = vmul.f32 2.0, %v75_v7 }
  0x93   :  { %v79_v11 = vsub.f32 %v78_v9, %v50_v8 }
  0x95   :  { %v84_v12 = vsub.f32 %v79_v11, %v110_v10 }
  0x97   :  { %85 = vst [vmem:[#allocation7] sm:$0xff] %v84_v12 }
  0x98   :  { %96 = dma.vmem_to_hbm [thread:$0]  %s92_s25, 128, %s94_s28, [#allocation4]  }
  0x99   :  { %187 = dma.done.wait [#allocation4], 128  }
  0x9a   :  { %188 = vsyncadd [#allocation4], 4294967168 }
  0x9b   :  { %101 = vsyncpa [#allocation3], 1 }
  0x9c   :  { %102 = vsyncpa [#allocation6], 1 }
  0x9d   :  { %103 = vsyncpa [#allocation4], 1 }

</bundles_post_ra>
